<compile_context>
chip_gen: v6e
topology: v6e:2x2x1
jax: 0.10.0
libtpu: 0.0.40
codegen_flags: <defaults>
</compile_context>

<pallas_src>
import functools

import jax
import jax.numpy as jnp
from jax.experimental import pallas as pl
from jax.experimental.pallas import tpu as pltpu


def _adailn_kernel(x_ref, p_ref, o_ref, *, eps):
    # x_ref : (Nb, C, HW)  Nb samples; channels on sublanes, spatial on lanes
    # p_ref : (Nb, C, 3)   packed [rho, gamma, beta] per (sample, channel)
    # o_ref : (Nb, C, HW)
    x = x_ref[...].astype(jnp.float32)                      # (Nb, C, HW)
    Nb, C, HW = x.shape

    p = p_ref[...].astype(jnp.float32)                      # (Nb, C, 3)
    rho = p[:, :, 0:1]                                      # (Nb, C, 1)
    gamma = p[:, :, 1:2]
    beta = p[:, :, 2:3]

    # ---- single streaming stats pass: per-(n,c) first/second moments ----
    s1 = jnp.sum(x, axis=2, keepdims=True)                  # (Nb, C, 1)
    in_mean = s1 * (1.0 / HW)
    d = x - in_mean
    s2 = jnp.sum(d * d, axis=2, keepdims=True)              # centered, (Nb, C, 1)
    in_rs = jax.lax.rsqrt(s2 * (1.0 / (HW - 1)) + eps)      # 1/sqrt(in_var+eps)

    # ---- LN stats from the per-channel partials (tiny (Nb,C,1) math) ----
    ln_mean = jnp.sum(s1, axis=1, keepdims=True) * (1.0 / (C * HW))   # (Nb,1,1)
    dm = in_mean - ln_mean
    ln_ss = jnp.sum(s2 + HW * dm * dm, axis=1, keepdims=True)         # (Nb,1,1)
    ln_rs = jax.lax.rsqrt(ln_ss * (1.0 / (C * HW - 1)) + eps)

    # ---- fold blend + affine into per-(n,c) scale/shift -> one FMA pass ----
    scale = gamma * (rho * in_rs + (1.0 - rho) * ln_rs)                    # (Nb,C,1)
    shift = beta - gamma * (rho * in_mean * in_rs
                            + (1.0 - rho) * ln_mean * ln_rs)               # (Nb,C,1)

    o_ref[...] = (x * scale + shift).astype(o_ref.dtype)


def _pick_samples_per_block(n, slab_bytes, target_bytes=1 << 20):
    """Largest divisor of n whose block is <= target (>=1 sample always)."""
    best = 1
    for d in range(1, n + 1):
        if n % d == 0 and d * slab_bytes <= target_bytes:
            best = d
    return best


@functools.partial(jax.jit, static_argnames=("eps",))
def adailn_forward(x_nchw, rho, gamma, beta, eps=1e-5):
    """adaILN forward.  x: (N,C,H,W); rho: (1,C,1,1) or (C,); gamma, beta: (N,C)."""
    N, C, H, W = x_nchw.shape
    HW = H * W
    out_dtype = x_nchw.dtype

    x = x_nchw.reshape(N, C, HW)                            # contiguous, no copy

    # Pack [rho, gamma, beta] -> (N, C, 3): one small DMA per grid step.
    rho_b = jnp.broadcast_to(rho.reshape(1, C).astype(jnp.float32), (N, C))
    params = jnp.stack(
        [rho_b, gamma.reshape(N, C).astype(jnp.float32),
         beta.reshape(N, C).astype(jnp.float32)], axis=-1)  # (N, C, 3)

    slab_bytes = C * HW * x.dtype.itemsize
    nb = _pick_samples_per_block(N, slab_bytes)
    grid = (N // nb,)

    # VMEM budget: double-buffered in/out blocks + f32 temporaries + headroom.
    blk_elems = nb * C * HW
    need = 2 * blk_elems * (x.dtype.itemsize + jnp.dtype(out_dtype).itemsize) \
        + 2 * blk_elems * 4 + (1 << 20)
    vmem_limit = int(min(64 << 20, max(32 << 20, need)))

    out = pl.pallas_call(
        functools.partial(_adailn_kernel, eps=eps),
        out_shape=jax.ShapeDtypeStruct((N, C, HW), out_dtype),
        grid=grid,
        in_specs=[
            pl.BlockSpec((nb, C, HW), lambda n: (n, 0, 0)),
            pl.BlockSpec((nb, C, 3), lambda n: (n, 0, 0)),
        ],
        out_specs=pl.BlockSpec((nb, C, HW), lambda n: (n, 0, 0)),
        compiler_params=pltpu.CompilerParams(
            dimension_semantics=("parallel",),              # batch blocks -> both TCs on v7x
            vmem_limit_bytes=vmem_limit),
    )(x, params)
    return out.reshape(N, C, H, W)


def adailn_ref(x, rho, gamma, beta, eps=1e-5):
    """Pure-JAX reference mirroring the PyTorch module (unbiased variance)."""
    x = x.astype(jnp.float32)
    in_mean = jnp.mean(x, axis=(2, 3), keepdims=True)
    in_var = jnp.var(x, axis=(2, 3), keepdims=True, ddof=1)
    out_in = (x - in_mean) / jnp.sqrt(in_var + eps)
    ln_mean = jnp.mean(x, axis=(1, 2, 3), keepdims=True)
    ln_var = jnp.var(x, axis=(1, 2, 3), keepdims=True, ddof=1)
    out_ln = (x - ln_mean) / jnp.sqrt(ln_var + eps)
    r = rho.reshape(1, -1, 1, 1)
    out = r * out_in + (1.0 - r) * out_ln
    return out * gamma[:, :, None, None] + beta[:, :, None, None]


if __name__ == "__main__":
    N, C, H, W = 2, 4, 16, 16
    key = jax.random.PRNGKey(0)
    kx, kg, kb = jax.random.split(key, 3)
    x = jax.random.normal(kx, (N, C, H, W), dtype=jnp.float32)
    rho = jnp.full((1, C, 1, 1), 0.9, dtype=jnp.float32)    # Parameter init .fill_(0.9)
    gamma = 1.0 + 0.1 * jax.random.normal(kg, (N, C), dtype=jnp.float32)
    beta = 0.1 * jax.random.normal(kb, (N, C), dtype=jnp.float32)

    out = adailn_forward(x, rho, gamma, beta)
    jax.block_until_ready(out)
    assert out.shape == (N, C, H, W), out.shape
    assert out.dtype == x.dtype, out.dtype

    ref = adailn_ref(x, rho, gamma, beta)
    max_err = float(jnp.max(jnp.abs(out.astype(jnp.float32) - ref)))
    assert jnp.allclose(out.astype(jnp.float32), ref, atol=1e-4, rtol=1e-4), max_err
    print("KERNEL_OK")
</pallas_src>

<mosaic_0001>
module attributes {stable_mosaic.version = 11 : i64} {
  func.func @_adailn_kernel(%arg0: i32, %arg1: memref<2x4x256xf32, #tpu.memory_space<vmem>>, %arg2: memref<2x4x3xf32, #tpu.memory_space<vmem>>, %arg3: memref<2x4x256xf32, #tpu.memory_space<vmem>>) attributes {dimension_semantics = [#tpu.dimension_semantics<parallel>], iteration_bounds = array<i64: 1>, scalar_prefetch = 0 : i64, scratch_operands = 0 : i64, tpu.core_type = #tpu.core_type<tc>, window_params = [{transform_indices = @transform_0, window_bounds = array<i64: 2, 4, 256>}, {transform_indices = @transform_1, window_bounds = array<i64: 2, 4, 3>}, {transform_indices = @transform_2, window_bounds = array<i64: 2, 4, 256>}]} {
    %c0 = arith.constant 0 : index
    %c0_0 = arith.constant 0 : index
    %c0_1 = arith.constant 0 : index
    %0 = vector.load %arg1[%c0, %c0_0, %c0_1] : memref<2x4x256xf32, #tpu.memory_space<vmem>>, vector<2x4x256xf32>
    %c0_2 = arith.constant 0 : index
    %c0_3 = arith.constant 0 : index
    %c0_4 = arith.constant 0 : index
    %1 = vector.load %arg2[%c0_2, %c0_3, %c0_4] : memref<2x4x3xf32, #tpu.memory_space<vmem>>, vector<2x4x3xf32>
    %2 = vector.extract_strided_slice %1 {offsets = [0, 0, 0], sizes = [2, 4, 1], strides = [1, 1, 1]} : vector<2x4x3xf32> to vector<2x4x1xf32>
    %3 = vector.extract_strided_slice %1 {offsets = [0, 0, 1], sizes = [2, 4, 1], strides = [1, 1, 1]} : vector<2x4x3xf32> to vector<2x4x1xf32>
    %4 = vector.extract_strided_slice %1 {offsets = [0, 0, 2], sizes = [2, 4, 1], strides = [1, 1, 1]} : vector<2x4x3xf32> to vector<2x4x1xf32>
    %cst = arith.constant dense<0.000000e+00> : vector<2x4xf32>
    %5 = vector.multi_reduction <add>, %0, %cst [2] : vector<2x4x256xf32> to vector<2x4xf32>
    %6 = vector.shape_cast %5 : vector<2x4xf32> to vector<2x4x1xf32>
    %cst_5 = arith.constant 3.906250e-03 : f32
    %7 = vector.broadcast %cst_5 : f32 to vector<2x4x1xf32>
    %8 = arith.mulf %6, %7 : vector<2x4x1xf32>
    %9 = vector.broadcast %8 : vector<2x4x1xf32> to vector<2x4x256xf32>
    %10 = arith.subf %0, %9 : vector<2x4x256xf32>
    %11 = arith.mulf %10, %10 : vector<2x4x256xf32>
    %cst_6 = arith.constant dense<0.000000e+00> : vector<2x4xf32>
    %12 = vector.multi_reduction <add>, %11, %cst_6 [2] : vector<2x4x256xf32> to vector<2x4xf32>
    %13 = vector.shape_cast %12 : vector<2x4xf32> to vector<2x4x1xf32>
    %cst_7 = arith.constant 0.00392156886 : f32
    %14 = vector.broadcast %cst_7 : f32 to vector<2x4x1xf32>
    %15 = arith.mulf %13, %14 : vector<2x4x1xf32>
    %cst_8 = arith.constant 9.99999974E-6 : f32
    %16 = vector.broadcast %cst_8 : f32 to vector<2x4x1xf32>
    %17 = arith.addf %15, %16 : vector<2x4x1xf32>
    %18 = math.rsqrt %17 : vector<2x4x1xf32>
    %cst_9 = arith.constant dense<0.000000e+00> : vector<2x1xf32>
    %19 = vector.multi_reduction <add>, %6, %cst_9 [1] : vector<2x4x1xf32> to vector<2x1xf32>
    %20 = vector.shape_cast %19 : vector<2x1xf32> to vector<2x1x1xf32>
    %cst_10 = arith.constant 9.765625E-4 : f32
    %21 = vector.broadcast %cst_10 : f32 to vector<2x1x1xf32>
    %22 = arith.mulf %20, %21 : vector<2x1x1xf32>
    %23 = vector.broadcast %22 : vector<2x1x1xf32> to vector<2x4x1xf32>
    %24 = arith.subf %8, %23 : vector<2x4x1xf32>
    %cst_11 = arith.constant 2.560000e+02 : f32
    %25 = vector.broadcast %cst_11 : f32 to vector<2x4x1xf32>
    %26 = arith.mulf %25, %24 : vector<2x4x1xf32>
    %27 = arith.mulf %26, %24 : vector<2x4x1xf32>
    %28 = arith.addf %13, %27 : vector<2x4x1xf32>
    %cst_12 = arith.constant dense<0.000000e+00> : vector<2x1xf32>
    %29 = vector.multi_reduction <add>, %28, %cst_12 [1] : vector<2x4x1xf32> to vector<2x1xf32>
    %30 = vector.shape_cast %29 : vector<2x1xf32> to vector<2x1x1xf32>
    %cst_13 = arith.constant 9.77517105E-4 : f32
    %31 = vector.broadcast %cst_13 : f32 to vector<2x1x1xf32>
    %32 = arith.mulf %30, %31 : vector<2x1x1xf32>
    %cst_14 = arith.constant 9.99999974E-6 : f32
    %33 = vector.broadcast %cst_14 : f32 to vector<2x1x1xf32>
    %34 = arith.addf %32, %33 : vector<2x1x1xf32>
    %35 = math.rsqrt %34 : vector<2x1x1xf32>
    %36 = arith.mulf %2, %18 : vector<2x4x1xf32>
    %cst_15 = arith.constant 1.000000e+00 : f32
    %37 = vector.broadcast %cst_15 : f32 to vector<2x4x1xf32>
    %38 = arith.subf %37, %2 : vector<2x4x1xf32>
    %39 = vector.broadcast %35 : vector<2x1x1xf32> to vector<2x4x1xf32>
    %40 = arith.mulf %38, %39 : vector<2x4x1xf32>
    %41 = arith.addf %36, %40 : vector<2x4x1xf32>
    %42 = arith.mulf %3, %41 : vector<2x4x1xf32>
    %43 = arith.mulf %2, %8 : vector<2x4x1xf32>
    %44 = arith.mulf %43, %18 : vector<2x4x1xf32>
    %cst_16 = arith.constant 1.000000e+00 : f32
    %45 = vector.broadcast %cst_16 : f32 to vector<2x4x1xf32>
    %46 = arith.subf %45, %2 : vector<2x4x1xf32>
    %47 = vector.broadcast %22 : vector<2x1x1xf32> to vector<2x4x1xf32>
    %48 = arith.mulf %46, %47 : vector<2x4x1xf32>
    %49 = vector.broadcast %35 : vector<2x1x1xf32> to vector<2x4x1xf32>
    %50 = arith.mulf %48, %49 : vector<2x4x1xf32>
    %51 = arith.addf %44, %50 : vector<2x4x1xf32>
    %52 = arith.mulf %3, %51 : vector<2x4x1xf32>
    %53 = arith.subf %4, %52 : vector<2x4x1xf32>
    %54 = vector.broadcast %42 : vector<2x4x1xf32> to vector<2x4x256xf32>
    %55 = arith.mulf %0, %54 : vector<2x4x256xf32>
    %56 = vector.broadcast %53 : vector<2x4x1xf32> to vector<2x4x256xf32>
    %57 = arith.addf %55, %56 : vector<2x4x256xf32>
    %c0_17 = arith.constant 0 : index
    %c0_18 = arith.constant 0 : index
    %c0_19 = arith.constant 0 : index
    %58 = vector.load %arg3[%c0_17, %c0_18, %c0_19] : memref<2x4x256xf32, #tpu.memory_space<vmem>>, vector<2x4x256xf32>
    tpu.vector_store %arg3[%c0_17, %c0_18, %c0_19], %57 {strides = array<i32>} : memref<2x4x256xf32, #tpu.memory_space<vmem>>, vector<2x4x256xf32>,
    return
  }
  func.func @transform_0(%arg0: i32) -> (i32, i32, i32) {
    %c0_i32 = arith.constant 0 : i32
    %c0_i32_0 = arith.constant 0 : i32
    %c0_i32_1 = arith.constant 0 : i32
    return %arg0, %c0_i32, %c0_i32_0 : i32, i32, i32
  }
  func.func @transform_1(%arg0: i32) -> (i32, i32, i32) {
    %c0_i32 = arith.constant 0 : i32
    %c0_i32_0 = arith.constant 0 : i32
    %c0_i32_1 = arith.constant 0 : i32
    return %arg0, %c0_i32, %c0_i32_0 : i32, i32, i32
  }
  func.func @transform_2(%arg0: i32) -> (i32, i32, i32) {
    %c0_i32 = arith.constant 0 : i32
    %c0_i32_0 = arith.constant 0 : i32
    %c0_i32_1 = arith.constant 0 : i32
    return %arg0, %c0_i32, %c0_i32_0 : i32, i32, i32
  }
}

</mosaic_0001>

<bundles_post_ra>
// kernel: adailn_forward.1
= control target key start
LH: loop header
LB: loop body
LE: loop exit
PB: predicated region body
PF: predicated region fallthrough
CT: control target
= control target key end

     0   :  { %vm21_vm0 = vcmask 1043456   ;;  %v246_v10 = vmov 839922192   ;;  %v39_v12 = vlaneseq  ;;  %s248_s16 = smov 1   ;;  %s327_s0 = inlined_call_operand.vmem [shape: f32[2,4,256], index: 0, kind: input, shape index: {}]   ;;  %s328_s1 = inlined_call_operand.vmem [shape: f32[2,4,3], index: 1, kind: input, shape index: {}]   ;;  %s329_s2 = inlined_call_operand.vmem [shape: f32[2,4,256], index: 2, kind: output, shape index: {}]  }
   0x1   :  { %v268_v0 = vld [vmem:[%s327_s0] sm:$0xff]  ;;  %v273_v1 = vld [vmem:[%s327_s0 + $0x8] sm:$0xff]  ;;  %v37_v11 = vunpack.c.l.s4 %v246_v10 }
   0x2   :  { %v17_v2 = vcombine.high %v268_v0, %v268_v0  ;;  %v22_v3 = vsel %vm21_vm0, %v268_v0, 0.0  ;;  %v18_v4 = vcombine.high %v273_v1, %v273_v1  ;;  %v27_v6 = vsel %vm21_vm0, %v273_v1, 0.0 }
   0x3   :  { %v38_v13 = vunpack.c.0.s8 %v37_v11  ;;  %v40_v14 = vshrl.u32 %v39_v12, 7 }
   0x4   :  { %v23_v5 = vsel %vm21_vm0, %v17_v2, 0.0  ;;  %v28_v7 = vsel %vm21_vm0, %v18_v4, 0.0 }
   0x5   :  { %v24_v8 = vadd.f32 %v23_v5, %v22_v3  ;;  %v29_v9 = vadd.f32 %v28_v7, %v27_v6  ;;  %v285_v15 = vsub.s32 %v38_v13, %v40_v14 }
   0x7   :  { %25 = vadd.xlane.f32.xlu0 %v24_v8 }
   0xb   :  { %30 = vadd.xlane.f32.xlu0 %v29_v9 }
  0x90   :  { %v26_v16 = vpop.xlane.xlu0 %25 }
  0x91   :  { %v287_v17 = vmul.f32 0.00390625, %v26_v16  ;;  %v78_v18 = vsel %vm21_vm0, %v26_v16, 0.0 }
  0x92   :  { %v79_v19 = vrot.slane %v78_v18, 4 }
  0x93   :  { %v42_v20 = vrot.slane %v287_v17, %v285_v15 }
  0x94   :  { %v80_v21 = vadd.f32 %v79_v19, %v78_v18  ;;  %v31_v22 = vpop.xlane.xlu0 %30 }
  0x95   :  { %v292_v23 = vmul.f32 0.00390625, %v31_v22  ;;  %v52_v24 = vsub.f32 %v268_v0, %v42_v20  ;;  %v85_v43 = vsel %vm21_vm0, %v31_v22, 0.0  ;;  %v13_v22 = vld [vmem:[%s328_s1] sm:$0xf] }
  0x96   :  { %v81_v25 = vrot.slane %v80_v21, 2  ;;  %v86_v44 = vrot.slane %v85_v43, 4 }
  0x97   :  { %v49_v26 = vrot.slane %v292_v23, %v285_v15  ;;  %v54_v27 = vmul.f32 %v52_v24, %v52_v24  ;;  %v124_v24 = vsub.f32 1.0, %v13_v22 }
  0x98   :  { %v82_v28 = vadd.f32 %v81_v25, %v80_v21  ;;  %v87_v45 = vadd.f32 %v86_v44, %v85_v43 }
  0x99   :  { %v58_v29 = vcombine.high %v54_v27, %v54_v27  ;;  %v53_v30 = vsub.f32 %v273_v1, %v49_v26  ;;  %v62_v32 = vsel %vm21_vm0, %v54_v27, 0.0  ;;  %v14_v26 = vld [vmem:[%s328_s1 + $0x4] sm:$0xf]  ;;  %v140_v27 = vmul.f32 %v287_v17, %v13_v22 }
  0x9a   :  { %v83_v31 = vrot.slane %v82_v28, 1  ;;  %v88_v46 = vrot.slane %v87_v45, 2 }
  0x9b   :  { %v63_v33 = vsel %vm21_vm0, %v58_v29, 0.0  ;;  %v55_v34 = vmul.f32 %v53_v30, %v53_v30  ;;  %v125_v29 = vsub.f32 1.0, %v14_v26 }
  0x9c   :  { %v84_v35 = vadd.f32 %v83_v31, %v82_v28  ;;  %v64_v36 = vadd.f32 %v63_v33, %v62_v32  ;;  %v89_v47 = vadd.f32 %v88_v46, %v87_v45  ;;  %v247_v33 = vmov 1  }
  0x9d   :  { %v59_v37 = vcombine.high %v55_v34, %v55_v34  ;;  %v67_v39 = vsel %vm21_vm0, %v55_v34, 0.0  ;;  %232 = vset.pattern.permute.xlu0 %v247_v33  ;;  %233 = vset.pattern.permute.xlu1 %v247_v33 }
  0x9e   :  { %v92_v38 = vmul.f32 0.0009765625, %v84_v35  ;;  %65 = vadd.xlane.f32.xlu1 %v64_v36  ;;  %v90_v48 = vrot.slane %v89_v47, 1  ;;  %v141_v35 = vmul.f32 %v292_v23, %v14_v26 }
  0x9f   :  { %v68_v40 = vsel %vm21_vm0, %v59_v37, 0.0 }
  0xa0   :  { %v69_v41 = vadd.f32 %v68_v40, %v67_v39  ;;  %v94_v42 = vsub.f32 %v287_v17, %v92_v38  ;;  %v91_v49 = vadd.f32 %v90_v48, %v89_v47  ;;  %v144_v28 = vmul.f32 %v124_v24, %v92_v38 }
  0xa2   :  { %70 = vadd.xlane.f32.xlu1 %v69_v41  ;;  %v93_v50 = vmul.f32 0.0009765625, %v91_v49  ;;  %v96_v51 = vmul.f32 256.0, %v94_v42 }
  0xa4   :  { %v95_v52 = vsub.f32 %v292_v23, %v93_v50  ;;  %v98_v53 = vmul.f32 %v96_v51, %v94_v42  ;;  %v145_v37 = vmul.f32 %v125_v29, %v93_v50 }
  0xa6   :  { %v97_v54 = vmul.f32 256.0, %v95_v52 }
  0xa8   :  { %v99_v58 = vmul.f32 %v97_v54, %v95_v52  ;;  %v249_v54 = vmov 2  }
 0x127   :  { %v66_v55 = vpop.xlane.xlu1 %65 }
 0x128   :  { %v100_v56 = vadd.f32 %v98_v53, %v66_v55  ;;  %v72_v4 = vmul.f32 0.003921569, %v66_v55 }
 0x12a   :  { %v102_v57 = vsel %vm21_vm0, %v100_v56, 0.0  ;;  %v74_v9 = vadd.f32 1e-05, %v72_v4 }
 0x12b   :  { %v103_v59 = vrot.slane %v102_v57, 4  ;;  %v71_v60 = vpop.xlane.xlu1 %70 }
 0x12c   :  { %v101_v61 = vadd.f32 %v99_v58, %v71_v60  ;;  %v73_v11 = vmul.f32 0.003921569, %v71_v60  ;;  %238 = vrsqrt.f32 %v74_v9 }
 0x12d   :  { %v104_v62 = vadd.f32 %v103_v59, %v102_v57 }
 0x12e   :  { %v109_v63 = vsel %vm21_vm0, %v101_v61, 0.0  ;;  %v75_v18 = vadd.f32 1e-05, %v73_v11 }
 0x12f   :  { %v105_v2 = vrot.slane %v104_v62, 2  ;;  %v110_v3 = vrot.slane %v109_v63, 4 }
 0x131   :  { %v106_v5 = vadd.f32 %v105_v2, %v104_v62  ;;  %v111_v6 = vadd.f32 %v110_v3, %v109_v63 }
 0x133   :  { %v107_v7 = vrot.slane %v106_v5, 1  ;;  %v112_v8 = vrot.slane %v111_v6, 2 }
 0x135   :  { %v108_v10 = vadd.f32 %v107_v7, %v106_v5  ;;  %v113_v12 = vadd.f32 %v112_v8, %v111_v6 }
 0x137   :  { %v116_v13 = vmul.f32 0.0009775171, %v108_v10  ;;  %v114_v14 = vrot.slane %v113_v12, 1 }
 0x139   :  { %v118_v16 = vadd.f32 1e-05, %v116_v13  ;;  %v115_v19 = vadd.f32 %v114_v14, %v113_v12  ;;  %v239_v25 = vpop.eup %238 }
 0x13a   :  { %v142_v31 = vmul.f32 %v239_v25, %v140_v27  ;;  %v122_v38 = vmul.f32 %v239_v25, %v13_v22 }
 0x13b   :  { %240 = vrsqrt.f32 %v118_v16  ;;  %v117_v20 = vmul.f32 0.0009775171, %v115_v19 }
 0x13c   :  { %242 = vrsqrt.f32 %v75_v18 }
 0x13d   :  { %v119_v21 = vadd.f32 1e-05, %v117_v20 }
 0x13f   :  { %244 = vrsqrt.f32 %v119_v21 }
 0x148   :  { %v241_v30 = vpop.eup %240 }
 0x149   :  { %v146_v32 = vmul.f32 %v241_v30, %v144_v28  ;;  %v243_v34 = vpop.eup %242  ;;  %v126_v17 = vmul.f32 %v241_v30, %v124_v24 }
 0x14a   :  { %v143_v40 = vmul.f32 %v243_v34, %v141_v35  ;;  %v123_v45 = vmul.f32 %v243_v34, %v14_v26 }
 0x14b   :  { %v148_v36 = vadd.f32 %v146_v32, %v142_v31  ;;  %v128_v43 = vadd.f32 %v126_v17, %v122_v38 }
 0x14c   :  { %v245_v39 = vpop.eup %244 }
 0x14d   :  { %152 = vrot.lane.b32.xlu0 %v148_v36, %s248_s16  ;;  %v147_v41 = vmul.f32 %v245_v39, %v145_v37  ;;  %v127_v44 = vmul.f32 %v245_v39, %v125_v29 }
 0x14f   :  { %v149_v42 = vadd.f32 %v147_v41, %v143_v40  ;;  %v129_v46 = vadd.f32 %v127_v44, %v123_v45 }
 0x151   :  { %154 = vrot.lane.b32.xlu1 %v149_v42, %s248_s16 }
 0x155   :  { %132 = vrot.lane.b32.xlu1 %v128_v43, %s248_s16 }
 0x159   :  { %134 = vrot.lane.b32.xlu1 %v129_v46, %s248_s16 }
 0x1bf   :  { %v153_v47 = vpop.permute.xlu0 %152 }
 0x1c0   :  { %v158_v48 = vmul.f32 %v153_v47, %v13_v22 }
 0x1c2   :  { %162 = vrot.lane.b32.xlu0 %v158_v48, %s248_s16 }
 0x1c3   :  { %v155_v23 = vpop.permute.xlu1 %154 }
 0x1c4   :  { %v159_v49 = vmul.f32 %v155_v23, %v14_v26 }
 0x1c6   :  { %164 = vrot.lane.b32.xlu1 %v159_v49, %s248_s16 }
 0x1c7   :  { %v133_v50 = vpop.permute.xlu1 %132 }
 0x1c8   :  { %v138_v51 = vmul.f32 %v133_v50, %v13_v22 }
 0x1ca   :  { %172 = vperm.xlu0 %232, %v138_v51  }
 0x1cb   :  { %v135_v52 = vpop.permute.xlu1 %134 }
 0x1cc   :  { %v139_v53 = vmul.f32 %v135_v52, %v14_v26 }
 0x1ce   :  { %176 = vperm.xlu1 %233, %v139_v53   ;;  %235 = vset.pattern.permute.xlu0 %v249_v54 }
 0x1d2   :  { %234 = vset.pattern.permute.xlu1 %v249_v54 }
 0x234   :  { %v163_v55 = vpop.permute.xlu0 %162 }
 0x235   :  { %v168_v56 = vsub.f32 %v13_v22, %v163_v55 }
 0x237   :  { %198 = vperm.xlu1 %234, %v168_v56  }
 0x238   :  { %v165_v57 = vpop.permute.xlu1 %164 }
 0x239   :  { %v169_v58 = vsub.f32 %v14_v26, %v165_v57 }
 0x23b   :  { %202 = vperm.xlu0 %235, %v169_v58  }
 0x245   :  { %v173_v59 = vpop.permute.xlu0 %172 }
 0x246   :  { %v184_v61 = vrot.slane %v173_v59, %v285_v15 }
 0x248   :  { %v194_v63 = vmul.f32 %v184_v61, %v268_v0 }
 0x249   :  { %v177_v60 = vpop.permute.xlu1 %176 }
 0x24a   :  { %v191_v2 = vrot.slane %v177_v60, %v285_v15 }
 0x24c   :  { %v195_v6 = vmul.f32 %v191_v2, %v273_v1 }
 0x2b2   :  { %v199_v62 = vpop.permute.xlu1 %198 }
 0x2b3   :  { %v210_v3 = vrot.slane %v199_v62, %v285_v15 }
 0x2b5   :  { %v220_v4 = vadd.f32 %v210_v3, %v194_v63 }
 0x2b6   :  { %v203_v5 = vpop.permute.xlu0 %202 }
 0x2b7   :  { %222 = vst [vmem:[%s329_s2] sm:$0xff] %v220_v4  ;;  %v217_v7 = vrot.slane %v203_v5, %v285_v15 }
 0x2b9   :  { %v221_v8 = vadd.f32 %v217_v7, %v195_v6 }
 0x2bb   :  { %223 = vst [vmem:[%s329_s2 + $0x8] sm:$0xff] %v221_v8 }

</bundles_post_ra>
